<compile_context>
chip_gen: v5e
topology: v5e:2x2
jax: 0.10.0
libtpu: 0.0.40
codegen_flags: <defaults>
</compile_context>

<pallas_src>
import functools

import jax
import jax.numpy as jnp
from jax.experimental import pallas as pl
from jax.experimental.pallas import tpu as pltpu


def _round_up(x, m):
    return (x + m - 1) // m * m


def _pad2(a, rows, cols):
    pr, pc = rows - a.shape[0], cols - a.shape[1]
    if pr or pc:
        a = jnp.pad(a, ((0, pr), (0, pc)))
    return a


def _default_num_batch_tiles():
    """1 grid step on single-TensorCore chips (v5e/v6e), 2 on v7x (2 TCs/chip)."""
    try:
        kind = jax.devices()[0].device_kind.lower()
    except Exception:
        return 1
    return 2 if "v7" in kind else 1


def _actor_kernel(f1_p, f2_p, x_ref, w1_ref, w2_ref, w3_ref, b_ref, o_ref):
    # Packed biases (f32): [b1 | b2 | b3], lane-aligned static slices.
    b1 = b_ref[:, :f1_p]
    b2 = b_ref[:, f1_p:f1_p + f2_p]
    b3 = b_ref[:, f1_p + f2_p:]

    # fc1 + relu  (cast state to compute dtype in-kernel; f32 accumulation).
    x = x_ref[...].astype(w1_ref.dtype)
    h1 = jnp.dot(x, w1_ref[...], preferred_element_type=jnp.float32)
    h1 = jnp.maximum(h1 + b1, 0.0)
    # fc2 + relu
    h2 = jnp.dot(h1.astype(w2_ref.dtype), w2_ref[...],
                 preferred_element_type=jnp.float32)
    h2 = jnp.maximum(h2 + b2, 0.0)
    # fc3 + tanh  (f32 tanh, store in output dtype — bf16 slab by default).
    h3 = jnp.dot(h2.astype(w3_ref.dtype), w3_ref[...],
                 preferred_element_type=jnp.float32)
    o_ref[...] = jnp.tanh(h3 + b3).astype(o_ref.dtype)


def prepare_actor_params(w1, b1, w2, b2, w3, b3, *, use_bf16=True):
    """One-time pad/cast/pack of parameters (hoisted out of the hot path).

    w_i are [in, out] (transposed vs. PyTorch); b_i are [1, out].
    Returns (w1p, w2p, w3p, bias_packed) ready for actor_forward.
    Zero padding of hidden/output dims to x128 is mathematically exact.
    """
    s, f1 = w1.shape
    f2 = w2.shape[1]
    a = w3.shape[1]
    f1_p, f2_p, a_p = _round_up(f1, 128), _round_up(f2, 128), _round_up(a, 128)
    wdtype = jnp.bfloat16 if use_bf16 else jnp.float32

    w1p = _pad2(w1, s, f1_p).astype(wdtype)       # state dim left at full extent
    w2p = _pad2(w2, f1_p, f2_p).astype(wdtype)
    w3p = _pad2(w3, f2_p, a_p).astype(wdtype)
    bias = jnp.concatenate(
        [_pad2(b1.reshape(1, -1), 1, f1_p),
         _pad2(b2.reshape(1, -1), 1, f2_p),
         _pad2(b3.reshape(1, -1), 1, a_p)], axis=1).astype(jnp.float32)
    return w1p, w2p, w3p, bias


@functools.partial(jax.jit, static_argnames=("action_size", "num_tiles"))
def actor_forward(state, w1p, w2p, w3p, bias, *, action_size, num_tiles=1):
    """state: [B, S] f32; prepared params from prepare_actor_params."""
    batch, s = state.shape
    f1_p, f2_p, a_p = w1p.shape[1], w2p.shape[1], w3p.shape[1]
    compute_dtype = w1p.dtype
    itemsize = jnp.dtype(compute_dtype).itemsize

    # Batch padding only (no feature padding, no extra casted copy of state).
    b_p = _round_up(max(batch, 1), 8 * num_tiles)
    tb = b_p // num_tiles
    x = state if b_p == batch else jnp.pad(state, ((0, b_p - batch), (0, 0)))

    flops = 2 * b_p * (s * f1_p + f1_p * f2_p + f2_p * a_p)
    bytes_accessed = (
        4 * b_p * s                                           # f32 state in
        + itemsize * (s * f1_p + f1_p * f2_p + f2_p * a_p)    # weights
        + 4 * (f1_p + f2_p + a_p)                             # packed biases
        + itemsize * b_p * a_p                                # output slab
    )

    kernel = functools.partial(_actor_kernel, f1_p, f2_p)

    out = pl.pallas_call(
        kernel,
        out_shape=jax.ShapeDtypeStruct((b_p, a_p), compute_dtype),
        grid=(num_tiles,),
        in_specs=[
            pl.BlockSpec((tb, s), lambda i: (i, 0)),                 # state: tiled over batch
            pl.BlockSpec((s, f1_p), lambda i: (0, 0)),               # weights: VMEM-resident
            pl.BlockSpec((f1_p, f2_p), lambda i: (0, 0)),
            pl.BlockSpec((f2_p, a_p), lambda i: (0, 0)),
            pl.BlockSpec((1, f1_p + f2_p + a_p), lambda i: (0, 0)),  # packed biases
        ],
        out_specs=pl.BlockSpec((tb, a_p), lambda i: (i, 0)),
        compiler_params=pltpu.CompilerParams(
            dimension_semantics=("parallel",)),                       # 2-way megacore on v7x
        cost_estimate=pl.CostEstimate(
            flops=flops, transcendentals=b_p * a_p, bytes_accessed=bytes_accessed),
    )(x, w1p, w2p, w3p, bias)

    return out[:batch, :action_size]


def init_actor_params(key, state_size, action_size, fc1, fc2):
    """Deterministic init mirroring Actor.reset_parameters().

    PyTorch Linear weight is [out, in]; hidden_init uses weight.size()[0] == out
    as 'fan_in' (reproducing that quirk).  fc3 weight ~ U(-3e-3, 3e-3).
    Biases keep PyTorch default: U(-1/sqrt(in_features), 1/sqrt(in_features)).
    Weights are returned pre-transposed to [in, out] for the kernel.
    """
    ks = jax.random.split(key, 6)

    def uniform(k, shape, lim):
        return jax.random.uniform(k, shape, jnp.float32, -lim, lim)

    lim1 = 1.0 / jnp.sqrt(jnp.float32(fc1))          # hidden_init(fc1): size()[0] == fc1
    lim2 = 1.0 / jnp.sqrt(jnp.float32(fc2))          # hidden_init(fc2): size()[0] == fc2
    w1 = uniform(ks[0], (state_size, fc1), lim1)     # [in, out]
    w2 = uniform(ks[1], (fc1, fc2), lim2)
    w3 = uniform(ks[2], (fc2, action_size), 3e-3)

    b1 = uniform(ks[3], (1, fc1), 1.0 / jnp.sqrt(jnp.float32(state_size)))
    b2 = uniform(ks[4], (1, fc2), 1.0 / jnp.sqrt(jnp.float32(fc1)))
    b3 = uniform(ks[5], (1, action_size), 1.0 / jnp.sqrt(jnp.float32(fc2)))
    return w1, b1, w2, b2, w3, b3


if __name__ == "__main__":
    key = jax.random.PRNGKey(0)
    k_state, k_params = jax.random.split(key)

    batch = 256            # batched states: amortizes launch overhead, fills MXU rows
    state_size, action_size, fc1, fc2 = 24, 4, 64, 32

    state = jax.random.normal(k_state, (batch, state_size), jnp.float32)
    w1, b1, w2, b2, w3, b3 = init_actor_params(
        k_params, state_size, action_size, fc1, fc2)

    # Pure-JAX f32 reference.
    ref = jnp.tanh(
        jnp.maximum(jnp.maximum(state @ w1 + b1, 0.0) @ w2 + b2, 0.0) @ w3 + b3
    )

    num_tiles = _default_num_batch_tiles()   # 1 on v5e/v6e, 2 on v7x

    # bf16-operand / f32-accumulate path; params prepared once (hoisted).
    params_bf16 = prepare_actor_params(w1, b1, w2, b2, w3, b3, use_bf16=True)
    out = actor_forward(state, *params_bf16,
                        action_size=action_size, num_tiles=num_tiles)
    jax.block_until_ready(out)
    assert out.shape == (batch, action_size)
    assert jnp.allclose(out.astype(jnp.float32), ref, atol=3e-2, rtol=3e-2), float(
        jnp.max(jnp.abs(out.astype(jnp.float32) - ref)))

    # Full-f32 path at a tiny batch (exercises batch padding / single-step grid).
    params_f32 = prepare_actor_params(w1, b1, w2, b2, w3, b3, use_bf16=False)
    out_f32 = actor_forward(state[:8], *params_f32,
                            action_size=action_size, num_tiles=1)
    jax.block_until_ready(out_f32)
    assert jnp.allclose(out_f32, ref[:8], atol=1e-5, rtol=1e-5)

    print("KERNEL_OK")
</pallas_src>

<mosaic_0001>
module attributes {stable_mosaic.version = 11 : i64} {
  func.func @_actor_kernel(%arg0: i32, %arg1: memref<256x24xf32, #tpu.memory_space<vmem>>, %arg2: memref<24x128xbf16, #tpu.memory_space<vmem>>, %arg3: memref<128x128xbf16, #tpu.memory_space<vmem>>, %arg4: memref<128x128xbf16, #tpu.memory_space<vmem>>, %arg5: memref<1x384xf32, #tpu.memory_space<vmem>>, %arg6: memref<256x128xbf16, #tpu.memory_space<vmem>>) attributes {dimension_semantics = [#tpu.dimension_semantics<parallel>], iteration_bounds = array<i64: 1>, scalar_prefetch = 0 : i64, scratch_operands = 0 : i64, tpu.core_type = #tpu.core_type<tc>, window_params = [{transform_indices = @transform_0, window_bounds = array<i64: 256, 24>}, {pipeline_mode = #tpu.pipeline_mode<synchronous>, transform_indices = @transform_1, window_bounds = array<i64: 24, 128>}, {pipeline_mode = #tpu.pipeline_mode<synchronous>, transform_indices = @transform_2, window_bounds = array<i64: 128, 128>}, {pipeline_mode = #tpu.pipeline_mode<synchronous>, transform_indices = @transform_3, window_bounds = array<i64: 128, 128>}, {pipeline_mode = #tpu.pipeline_mode<synchronous>, transform_indices = @transform_4, window_bounds = array<i64: 1, 384>}, {transform_indices = @transform_5, window_bounds = array<i64: 256, 128>}]} {
    %c0 = arith.constant 0 : index
    %c0_0 = arith.constant 0 : index
    %0 = vector.load %arg5[%c0, %c0_0] : memref<1x384xf32, #tpu.memory_space<vmem>>, vector<1x128xf32>
    %c0_1 = arith.constant 0 : index
    %c128 = arith.constant 128 : index
    %1 = vector.load %arg5[%c0_1, %c128] : memref<1x384xf32, #tpu.memory_space<vmem>>, vector<1x128xf32>
    %c0_2 = arith.constant 0 : index
    %c256 = arith.constant 256 : index
    %2 = vector.load %arg5[%c0_2, %c256] : memref<1x384xf32, #tpu.memory_space<vmem>>, vector<1x128xf32>
    %c0_3 = arith.constant 0 : index
    %c0_4 = arith.constant 0 : index
    %3 = vector.load %arg1[%c0_3, %c0_4] : memref<256x24xf32, #tpu.memory_space<vmem>>, vector<256x24xf32>
    %4 = arith.truncf %3 : vector<256x24xf32> to vector<256x24xbf16>
    %c0_5 = arith.constant 0 : index
    %c0_6 = arith.constant 0 : index
    %5 = vector.load %arg2[%c0_5, %c0_6] : memref<24x128xbf16, #tpu.memory_space<vmem>>, vector<24x128xbf16>
    %cst = arith.constant dense<0.000000e+00> : vector<256x128xf32>
    %6 = tpu.matmul %4, %5, %cst {dimension_numbers = #tpu.dot_dimension_numbers<[1], [0], [0], [1], [0, 0, 1, 1], [], []>} : vector<256x24xbf16>, vector<24x128xbf16>, vector<256x128xf32> -> vector<256x128xf32>
    %7 = vector.broadcast %0 : vector<1x128xf32> to vector<256x128xf32>
    %8 = arith.addf %6, %7 : vector<256x128xf32>
    %cst_7 = arith.constant 0.000000e+00 : f32
    %9 = vector.broadcast %cst_7 : f32 to vector<256x128xf32>
    %10 = arith.maximumf %8, %9 : vector<256x128xf32>
    %11 = arith.truncf %10 : vector<256x128xf32> to vector<256x128xbf16>
    %c0_8 = arith.constant 0 : index
    %c0_9 = arith.constant 0 : index
    %12 = vector.load %arg3[%c0_8, %c0_9] : memref<128x128xbf16, #tpu.memory_space<vmem>>, vector<128x128xbf16>
    %cst_10 = arith.constant dense<0.000000e+00> : vector<256x128xf32>
    %13 = tpu.matmul %11, %12, %cst_10 {dimension_numbers = #tpu.dot_dimension_numbers<[1], [0], [0], [1], [0, 0, 1, 1], [], []>} : vector<256x128xbf16>, vector<128x128xbf16>, vector<256x128xf32> -> vector<256x128xf32>
    %14 = vector.broadcast %1 : vector<1x128xf32> to vector<256x128xf32>
    %15 = arith.addf %13, %14 : vector<256x128xf32>
    %cst_11 = arith.constant 0.000000e+00 : f32
    %16 = vector.broadcast %cst_11 : f32 to vector<256x128xf32>
    %17 = arith.maximumf %15, %16 : vector<256x128xf32>
    %18 = arith.truncf %17 : vector<256x128xf32> to vector<256x128xbf16>
    %c0_12 = arith.constant 0 : index
    %c0_13 = arith.constant 0 : index
    %19 = vector.load %arg4[%c0_12, %c0_13] : memref<128x128xbf16, #tpu.memory_space<vmem>>, vector<128x128xbf16>
    %cst_14 = arith.constant dense<0.000000e+00> : vector<256x128xf32>
    %20 = tpu.matmul %18, %19, %cst_14 {dimension_numbers = #tpu.dot_dimension_numbers<[1], [0], [0], [1], [0, 0, 1, 1], [], []>} : vector<256x128xbf16>, vector<128x128xbf16>, vector<256x128xf32> -> vector<256x128xf32>
    %21 = vector.broadcast %2 : vector<1x128xf32> to vector<256x128xf32>
    %22 = arith.addf %20, %21 : vector<256x128xf32>
    %23 = math.tanh %22 : vector<256x128xf32>
    %24 = arith.truncf %23 : vector<256x128xf32> to vector<256x128xbf16>
    %c0_15 = arith.constant 0 : index
    %c0_16 = arith.constant 0 : index
    %25 = vector.load %arg6[%c0_15, %c0_16] : memref<256x128xbf16, #tpu.memory_space<vmem>>, vector<256x128xbf16>
    tpu.vector_store %arg6[%c0_15, %c0_16], %24 {strides = array<i32>} : memref<256x128xbf16, #tpu.memory_space<vmem>>, vector<256x128xbf16>,
    return
  }
  func.func @transform_0(%arg0: i32) -> (i32, i32) {
    %c0_i32 = arith.constant 0 : i32
    %c0_i32_0 = arith.constant 0 : i32
    return %arg0, %c0_i32 : i32, i32
  }
  func.func @transform_1(%arg0: i32) -> (i32, i32) {
    %c0_i32 = arith.constant 0 : i32
    %c0_i32_0 = arith.constant 0 : i32
    %c0_i32_1 = arith.constant 0 : i32
    return %c0_i32, %c0_i32_0 : i32, i32
  }
  func.func @transform_2(%arg0: i32) -> (i32, i32) {
    %c0_i32 = arith.constant 0 : i32
    %c0_i32_0 = arith.constant 0 : i32
    %c0_i32_1 = arith.constant 0 : i32
    return %c0_i32, %c0_i32_0 : i32, i32
  }
  func.func @transform_3(%arg0: i32) -> (i32, i32) {
    %c0_i32 = arith.constant 0 : i32
    %c0_i32_0 = arith.constant 0 : i32
    %c0_i32_1 = arith.constant 0 : i32
    return %c0_i32, %c0_i32_0 : i32, i32
  }
  func.func @transform_4(%arg0: i32) -> (i32, i32) {
    %c0_i32 = arith.constant 0 : i32
    %c0_i32_0 = arith.constant 0 : i32
    %c0_i32_1 = arith.constant 0 : i32
    return %c0_i32, %c0_i32_0 : i32, i32
  }
  func.func @transform_5(%arg0: i32) -> (i32, i32) {
    %c0_i32 = arith.constant 0 : i32
    %c0_i32_0 = arith.constant 0 : i32
    return %arg0, %c0_i32 : i32, i32
  }
}

</mosaic_0001>

<bundles_post_ra>
// kernel: actor_forward.1
= control target key start
LH: loop header
LB: loop body
LE: loop exit
PB: predicated region body
PF: predicated region fallthrough
CT: control target
= control target key end

     0   :  { %vm136_vm0 = vcmask 1043456   ;;  %vm87_vm1 = vcmask 195584   ;;  %s1373_s1 = inlined_call_operand.vmem [shape: bf16[24,128], index: 1, kind: input, shape index: {}]   ;;  %s1374_s4 = inlined_call_operand.vmem [shape: f32[1,384], index: 4, kind: input, shape index: {}]   ;;  %s1375_s0 = inlined_call_operand.vmem [shape: f32[256,24], index: 0, kind: input, shape index: {}]   ;;  %s1376_s2 = inlined_call_operand.vmem [shape: bf16[128,128], index: 2, kind: input, shape index: {}]   ;;  %s1377_s3 = inlined_call_operand.vmem [shape: bf16[128,128], index: 3, kind: input, shape index: {}]   ;;  %s1378_s5 = inlined_call_operand.vmem [shape: bf16[256,128], index: 5, kind: output, shape index: {}]  }
   0x1   :  { %v74_v0 = vld [vmem:[%s1373_s1 + $0x8] sm:$0xf]  ;;  %v821_v4 = vld [vmem:[%s1373_s1] sm:$0xff]  ;;  %v26_v8 = vld [vmem:[%s1375_s0 + $0x10] sm:$0xff] }
   0x2   :  { %v83_v1 = vunpack.c.l.b16 %v74_v0  ;;  %v24_v5 = vld [vmem:[%s1375_s0] sm:$0xff]  ;;  %v25_v6 = vld [vmem:[%s1375_s0 + $0x8] sm:$0xff]  ;;  %v27_v9 = vld [vmem:[%s1375_s0 + $0x18] sm:$0xff] }
   0x3   :  { %v56_v7 = vpack.c.bf16 %v25_v6, %v24_v5  ;;  %v57_v10 = vpack.c.bf16 %v27_v9, %v26_v8  ;;  %v28_v11 = vld [vmem:[%s1375_s0 + $0x20] sm:$0xff]  ;;  %v29_v12 = vld [vmem:[%s1375_s0 + $0x28] sm:$0xff]  ;;  %v30_v14 = vld [vmem:[%s1375_s0 + $0x30] sm:$0xff] }
   0x4   :  { %v85_v2 = vpack.c.b16 %v83_v1, %v83_v1  ;;  %v58_v13 = vpack.c.bf16 %v29_v12, %v28_v11  ;;  %v31_v15 = vld [vmem:[%s1375_s0 + $0x38] sm:$0xff]  ;;  %v32_v17 = vld [vmem:[%s1375_s0 + $0x40] sm:$0xff]  ;;  %v33_v18 = vld [vmem:[%s1375_s0 + $0x48] sm:$0xff] }
   0x5   :  { %v59_v16 = vpack.c.bf16 %v31_v15, %v30_v14  ;;  %v60_v19 = vpack.c.bf16 %v33_v18, %v32_v17  ;;  %v829_v20 = vld [vmem:[%s1376_s2 + $0x38] sm:$0xff]  ;;  %v34_v21 = vld [vmem:[%s1375_s0 + $0x50] sm:$0xff]  ;;  %v827_v25 = vld [vmem:[%s1376_s2 + $0x28] sm:$0xff] }
   0x6   :  { %v138_v3 = vsel %vm136_vm0, %v85_v2, 0  ;;  %344 = vmatpush.bf16.msra.mxu1 %v829_v20  ;;  %v35_v22 = vld [vmem:[%s1375_s0 + $0x58] sm:$0xff]  ;;  %v828_v24 = vld [vmem:[%s1376_s2 + $0x30] sm:$0xff]  ;;  %v826_v26 = vld [vmem:[%s1376_s2 + $0x20] sm:$0xff] }
   0x7   :  { %146 = vmatpush.bf16.msra.mxu0 %v138_v3  ;;  %933 = vmatpush.bf16.msra.mxu3 %v138_v3  ;;  %v61_v23 = vpack.c.bf16 %v35_v22, %v34_v21  ;;  %v36_v27 = vld [vmem:[%s1375_s0 + $0x60] sm:$0xff]  ;;  %v37_v28 = vld [vmem:[%s1375_s0 + $0x68] sm:$0xff]  ;;  %v825_v29 = vld [vmem:[%s1376_s2 + $0x18] sm:$0xff] }
   0x8   :  { %v62_v30 = vpack.c.bf16 %v37_v28, %v36_v27  ;;  %v824_v31 = vld [vmem:[%s1376_s2 + $0x10] sm:$0xff]  ;;  %v823_v32 = vld [vmem:[%s1376_s2 + $0x8] sm:$0xff]  ;;  %v822_v33 = vld [vmem:[%s1376_s2] sm:$0xff] }
   0x9   :  { %v38_v34 = vld [vmem:[%s1375_s0 + $0x70] sm:$0xff]  ;;  %v39_v35 = vld [vmem:[%s1375_s0 + $0x78] sm:$0xff]  ;;  %v40_v37 = vld [vmem:[%s1375_s0 + $0x80] sm:$0xff] }
   0xa   :  { %345 = vmatpush.bf16.msra.mxu1 %v828_v24  ;;  %v63_v36 = vpack.c.bf16 %v39_v35, %v38_v34  ;;  %v41_v38 = vld [vmem:[%s1375_s0 + $0x88] sm:$0xff]  ;;  %v1143_v41 = vld [vmem:[%s1374_s4] ss:$0 sm:$0xff]  ;;  %v42_v47 = vld [vmem:[%s1375_s0 + $0x90] sm:$0xff] }
   0xb   :  { %147 = vmatpush.bf16.msra.mxu0 %v821_v4  ;;  %934 = vmatpush.bf16.msra.mxu3 %v821_v4  ;;  %v64_v39 = vpack.c.bf16 %v41_v38, %v40_v37  ;;  %v43_v48 = vld [vmem:[%s1375_s0 + $0x98] sm:$0xff]  ;;  %v44_v57 = vld [vmem:[%s1375_s0 + $0xa0] sm:$0xff]  ;;  %v45_v58 = vld [vmem:[%s1375_s0 + $0xa8] sm:$0xff] }
   0xc   :  { %v65_v50 = vpack.c.bf16 %v43_v48, %v42_v47  ;;  %v66_v60 = vpack.c.bf16 %v45_v58, %v44_v57  ;;  %v50_v62 = vld [vmem:[%s1375_s0 + $0xd0] sm:$0xff]  ;;  %v51_v63 = vld [vmem:[%s1375_s0 + $0xd8] sm:$0xff]  ;;  %v52_v11 = vld [vmem:[%s1375_s0 + $0xe0] sm:$0xff] }
   0xd   :  { %v69_v0 = vpack.c.bf16 %v51_v63, %v50_v62  ;;  %v46_v6 = vld [vmem:[%s1375_s0 + $0xb0] sm:$0xff]  ;;  %v53_v12 = vld [vmem:[%s1375_s0 + $0xe8] sm:$0xff]  ;;  %v837_v37 = vld [vmem:[%s1377_s3 + $0x38] sm:$0xff] }
   0xe   :  { %741 = vmatmul.msk.bf16.vlgmr.msra.gmra.mxu0 %vm87_vm1, %v56_v7  ;;  %346 = vmatpush.bf16.msra.mxu1 %v827_v25  ;;  %v47_v7 = vld [vmem:[%s1375_s0 + $0xb8] sm:$0xff] }
   0xf   :  { %935 = vmatpush.bf16.msrb.mxu3 %v829_v20  ;;  %v67_v9 = vpack.c.bf16 %v47_v7, %v46_v6  ;;  %v49_v20 = vld [vmem:[%s1375_s0 + $0xc8] sm:$0xff]  ;;  %548 = vmatpush.bf16.msra.mxu2 %v837_v37  ;;  %v1240_v7 = vld [vmem:[%s1374_s4 + $0x1] ss:$0 sm:$0xff] }
  0x10   :  { %754 = vmatmul.msk.bf16.vlgmr.msra.gmra.mxu3 %vm87_vm1, %v69_v0 }
  0x12   :  { %347 = vmatpush.bf16.msra.mxu1 %v826_v26 }
  0x13   :  { %936 = vmatpush.bf16.msrb.mxu3 %v828_v24  ;;  %v54_v24 = vld [vmem:[%s1375_s0 + $0xf0] sm:$0xff] }
  0x16   :  { %348 = vmatpush.bf16.msra.mxu1 %v825_v29 }
  0x17   :  { %937 = vmatpush.bf16.msrb.mxu3 %v827_v25  ;;  %v55_v25 = vld [vmem:[%s1375_s0 + $0xf8] sm:$0xff] }
  0x1a   :  { %349 = vmatpush.bf16.msra.mxu1 %v824_v31 }
  0x1b   :  { %938 = vmatpush.bf16.msrb.mxu3 %v826_v26  ;;  %v71_v26 = vpack.c.bf16 %v55_v25, %v54_v24 }
  0x1e   :  { %742 = vmatmul.msk.bf16.gmra.mxu0 %vm87_vm1, %v57_v10  ;;  %350 = vmatpush.bf16.msra.mxu1 %v823_v32 }
  0x1f   :  { %939 = vmatpush.bf16.msrb.mxu3 %v825_v29 }
  0x22   :  { %351 = vmatpush.bf16.msra.mxu1 %v822_v33 }
  0x23   :  { %940 = vmatpush.bf16.msrb.mxu3 %v824_v31 }
  0x27   :  { %941 = vmatpush.bf16.msrb.mxu3 %v823_v32 }
  0x2b   :  { %942 = vmatpush.bf16.msrb.mxu3 %v822_v33 }
  0x2e   :  { %743 = vmatmul.msk.bf16.gmra.mxu0 %vm87_vm1, %v58_v13  ;;  %v70_v13 = vpack.c.bf16 %v53_v12, %v52_v11 }
  0x2f   :  { %943 = vmatpush.bf16.msra.mxu3 %v837_v37 }
  0x30   :  { %755 = vmatmul.msk.bf16.gmra.mxu3 %vm87_vm1, %v70_v13 }
  0x3e   :  { %744 = vmatmul.msk.bf16.gmra.mxu0 %vm87_vm1, %v59_v16 }
  0x40   :  { %756 = vmatmul.msk.bf16.gmra.mxu3 %vm87_vm1, %v71_v26 }
  0x4e   :  { %745 = vmatmul.msk.bf16.gmra.mxu0 %vm87_vm1, %v60_v19  ;;  %v48_v19 = vld [vmem:[%s1375_s0 + $0xc0] sm:$0xff] }
  0x4f   :  { %v68_v22 = vpack.c.bf16 %v49_v20, %v48_v19 }
  0x5e   :  { %746 = vmatmul.msk.bf16.gmra.mxu0 %vm87_vm1, %v61_v23 }
  0x6e   :  { %747 = vmatmul.msk.bf16.gmra.mxu0 %vm87_vm1, %v62_v30 }
  0x7e   :  { %748 = vmatmul.msk.bf16.gmra.mxu0 %vm87_vm1, %v63_v36 }
  0x8b   :  { %v149_v40 = vpop.f32.mrf.mxu0 }
  0x8c   :  { %v150_v42 = vadd.f32 %v1143_v41, %v149_v40 }
  0x8e   :  { %749 = vmatmul.msk.bf16.gmra.mxu0 %vm87_vm1, %v64_v39  ;;  %v229_v45 = vmax.f32 %v150_v42, 0.0  ;;  %v836_v42 = vld [vmem:[%s1377_s3 + $0x30] sm:$0xff] }
  0x8f   :  { %549 = vmatpush.bf16.msra.mxu2 %v836_v42  ;;  %944 = vmatpush.bf16.msra.mxu3 %v836_v42 }
  0x93   :  { %v151_v43 = vpop.f32.mrf.mxu0 }
  0x94   :  { %v152_v44 = vadd.f32 %v1143_v41, %v151_v43 }
  0x96   :  { %v230_v46 = vmax.f32 %v152_v44, 0.0  ;;  %v835_v44 = vld [vmem:[%s1377_s3 + $0x28] sm:$0xff] }
  0x97   :  { %550 = vmatpush.bf16.msra.mxu2 %v835_v44  ;;  %945 = vmatpush.bf16.msra.mxu3 %v835_v44 }
  0x98   :  { %v261_v49 = vpack.c.bf16 %v230_v46, %v229_v45  ;;  %v834_v45 = vld [vmem:[%s1377_s3 + $0x20] sm:$0xff] }
  0x9a   :  { %352 = vmatmul.bf16.vlgmr.msra.gmra.mxu1 %v261_v49  ;;  %v833_v49 = vld [vmem:[%s1377_s3 + $0x18] sm:$0xff] }
  0x9b   :  { %v154_v51 = vpop.f32.mrf.mxu0  ;;  %551 = vmatpush.bf16.msra.mxu2 %v834_v45  ;;  %946 = vmatpush.bf16.msra.mxu3 %v834_v45 }
  0x9c   :  { %v155_v52 = vadd.f32 %v1143_v41, %v154_v51 }
  0x9e   :  { %750 = vmatmul.msk.bf16.gmra.mxu0 %vm87_vm1, %v65_v50  ;;  %v231_v55 = vmax.f32 %v155_v52, 0.0 }
  0x9f   :  { %552 = vmatpush.bf16.msra.mxu2 %v833_v49  ;;  %947 = vmatpush.bf16.msra.mxu3 %v833_v49 }
  0xa3   :  { %v156_v53 = vpop.f32.mrf.mxu0 }
  0xa4   :  { %v157_v54 = vadd.f32 %v1143_v41, %v156_v53  ;;  %v832_v53 = vld [vmem:[%s1377_s3 + $0x10] sm:$0xff] }
  0xa5   :  { %553 = vmatpush.bf16.msra.mxu2 %v832_v53  ;;  %948 = vmatpush.bf16.msra.mxu3 %v832_v53 }
  0xa6   :  { %v232_v56 = vmax.f32 %v157_v54, 0.0 }
  0xa8   :  { %v262_v59 = vpack.c.bf16 %v232_v56, %v231_v55  ;;  %v831_v55 = vld [vmem:[%s1377_s3 + $0x8] sm:$0xff]  ;;  %v830_v56 = vld [vmem:[%s1377_s3] sm:$0xff] }
  0xa9   :  { %554 = vmatpush.bf16.msra.mxu2 %v831_v55  ;;  %949 = vmatpush.bf16.msra.mxu3 %v831_v55 }
  0xaa   :  { %357 = vmatmul.bf16.gmra.mxu1 %v262_v59 }
  0xab   :  { %v159_v61 = vpop.f32.mrf.mxu0 }
  0xac   :  { %v160_v1 = vadd.f32 %v1143_v41, %v159_v61 }
  0xad   :  { %555 = vmatpush.bf16.msra.mxu2 %v830_v56  ;;  %950 = vmatpush.bf16.msra.mxu3 %v830_v56 }
  0xae   :  { %751 = vmatmul.msk.bf16.gmra.mxu0 %vm87_vm1, %v66_v60  ;;  %v233_v4 = vmax.f32 %v160_v1, 0.0 }
  0xb3   :  { %v161_v2 = vpop.f32.mrf.mxu0 }
  0xb4   :  { %v162_v3 = vadd.f32 %v1143_v41, %v161_v2 }
  0xb6   :  { %v234_v5 = vmax.f32 %v162_v3, 0.0 }
  0xb8   :  { %v263_v8 = vpack.c.bf16 %v234_v5, %v233_v4 }
  0xba   :  { %362 = vmatmul.bf16.gmra.mxu1 %v263_v8 }
  0xbb   :  { %v164_v10 = vpop.f32.mrf.mxu0 }
  0xbc   :  { %v165_v14 = vadd.f32 %v1143_v41, %v164_v10 }
  0xbe   :  { %752 = vmatmul.msk.bf16.gmra.mxu0 %vm87_vm1, %v67_v9  ;;  %v235_v17 = vmax.f32 %v165_v14, 0.0 }
  0xc3   :  { %v166_v15 = vpop.f32.mrf.mxu0 }
  0xc4   :  { %v167_v16 = vadd.f32 %v1143_v41, %v166_v15 }
  0xc6   :  { %v236_v18 = vmax.f32 %v167_v16, 0.0 }
  0xc8   :  { %v264_v21 = vpack.c.bf16 %v236_v18, %v235_v17 }
  0xca   :  { %367 = vmatmul.bf16.gmra.mxu1 %v264_v21 }
  0xcb   :  { %v169_v23 = vpop.f32.mrf.mxu0 }
  0xcc   :  { %v170_v27 = vadd.f32 %v1143_v41, %v169_v23 }
  0xce   :  { %753 = vmatmul.msk.bf16.gmra.mxu0 %vm87_vm1, %v68_v22  ;;  %v237_v30 = vmax.f32 %v170_v27, 0.0 }
  0xd3   :  { %v171_v28 = vpop.f32.mrf.mxu0 }
  0xd4   :  { %v172_v29 = vadd.f32 %v1143_v41, %v171_v28 }
  0xd6   :  { %v238_v31 = vmax.f32 %v172_v29, 0.0 }
  0xd8   :  { %v265_v32 = vpack.c.bf16 %v238_v31, %v237_v30 }
  0xda   :  { %372 = vmatmul.bf16.gmra.mxu1 %v265_v32 }
  0xdb   :  { %v174_v33 = vpop.f32.mrf.mxu0 }
  0xdc   :  { %v175_v34 = vadd.f32 %v1143_v41, %v174_v33 }
  0xde   :  { %v239_v38 = vmax.f32 %v175_v34, 0.0 }
  0xe3   :  { %v176_v35 = vpop.f32.mrf.mxu0 }
  0xe4   :  { %v177_v36 = vadd.f32 %v1143_v41, %v176_v35 }
  0xe6   :  { %v240_v39 = vmax.f32 %v177_v36, 0.0 }
  0xe8   :  { %v266_v40 = vpack.c.bf16 %v240_v39, %v239_v38 }
  0xea   :  { %377 = vmatmul.bf16.gmra.mxu1 %v266_v40 }
  0xeb   :  { %v179_v43 = vpop.f32.mrf.mxu0 }
  0xec   :  { %v180_v46 = vadd.f32 %v1143_v41, %v179_v43 }
  0xee   :  { %v241_v50 = vmax.f32 %v180_v46, 0.0 }
  0xf3   :  { %v181_v47 = vpop.f32.mrf.mxu0 }
  0xf4   :  { %v182_v48 = vadd.f32 %v1143_v41, %v181_v47 }
  0xf6   :  { %v242_v51 = vmax.f32 %v182_v48, 0.0 }
  0xf8   :  { %v267_v52 = vpack.c.bf16 %v242_v51, %v241_v50 }
  0xfa   :  { %382 = vmatmul.bf16.gmra.mxu1 %v267_v52  ;;  %v214_v52 = vpop.f32.mrf.mxu3 }
  0xfb   :  { %v184_v54 = vpop.f32.mrf.mxu0 }
  0xfc   :  { %v185_v57 = vadd.f32 %v1143_v41, %v184_v54 }
  0xfe   :  { %v243_v60 = vmax.f32 %v185_v57, 0.0 }
 0x103   :  { %v186_v58 = vpop.f32.mrf.mxu0 }
 0x104   :  { %v187_v59 = vadd.f32 %v1143_v41, %v186_v58 }
 0x106   :  { %v244_v61 = vmax.f32 %v187_v59, 0.0 }
 0x108   :  { %v268_v62 = vpack.c.bf16 %v244_v61, %v243_v60 }
 0x10a   :  { %387 = vmatmul.bf16.gmra.mxu1 %v268_v62  ;;  %v216_v62 = vpop.f32.mrf.mxu3 }
 0x10b   :  { %v189_v63 = vpop.f32.mrf.mxu0 }
 0x10c   :  { %v190_v0 = vadd.f32 %v1143_v41, %v189_v63 }
 0x10e   :  { %v245_v3 = vmax.f32 %v190_v0, 0.0 }
 0x113   :  { %v191_v1 = vpop.f32.mrf.mxu0 }
 0x114   :  { %v192_v2 = vadd.f32 %v1143_v41, %v191_v1 }
 0x116   :  { %v246_v4 = vmax.f32 %v192_v2, 0.0 }
 0x117   :  { %v353_v5 = vpop.f32.mrf.mxu1 }
 0x118   :  { %v269_v6 = vpack.c.bf16 %v246_v4, %v245_v3  ;;  %v354_v9 = vadd.f32 %v1240_v7, %v353_v5  ;;  %v219_v5 = vpop.f32.mrf.mxu3 }
 0x11a   :  { %392 = vmatmul.bf16.gmra.mxu1 %v269_v6  ;;  %v433_v12 = vmax.f32 %v354_v9, 0.0  ;;  %v215_v6 = vadd.f32 %v1143_v41, %v214_v52 }
 0x11b   :  { %v194_v8 = vpop.f32.mrf.mxu0 }
 0x11c   :  { %v195_v13 = vadd.f32 %v1143_v41, %v194_v8  ;;  %v217_v8 = vadd.f32 %v1143_v41, %v216_v62 }
 0x11e   :  { %v247_v18 = vmax.f32 %v195_v13, 0.0  ;;  %v256_v13 = vmax.f32 %v217_v8, 0.0 }
 0x11f   :  { %v355_v10 = vpop.f32.mrf.mxu1 }
 0x120   :  { %v356_v11 = vadd.f32 %v1240_v7, %v355_v10 }
 0x122   :  { %v434_v14 = vmax.f32 %v356_v11, 0.0 }
 0x123   :  { %v196_v15 = vpop.f32.mrf.mxu0 }
 0x124   :  { %v197_v16 = vadd.f32 %v1143_v41, %v196_v15  ;;  %v465_v17 = vpack.c.bf16 %v434_v14, %v433_v12  ;;  %v255_v12 = vmax.f32 %v215_v6, 0.0 }
 0x126   :  { %v248_v19 = vmax.f32 %v197_v16, 0.0  ;;  %556 = vmatmul.bf16.vlgmr.msra.gmra.mxu2 %v465_v17  ;;  %v274_v16 = vpack.c.bf16 %v256_v13, %v255_v12  ;;  %v221_v17 = vpop.f32.mrf.mxu3 }
 0x127   :  { %v358_v20 = vpop.f32.mrf.mxu1 }
 0x128   :  { %v270_v21 = vpack.c.bf16 %v248_v19, %v247_v18  ;;  %v359_v23 = vadd.f32 %v1240_v7, %v358_v20  ;;  %v220_v20 = vadd.f32 %v1143_v41, %v219_v5 }
 0x12a   :  { %397 = vmatmul.bf16.gmra.mxu1 %v270_v21  ;;  %v435_v26 = vmax.f32 %v359_v23, 0.0  ;;  %v222_v21 = vadd.f32 %v1143_v41, %v221_v17 }
 0x12b   :  { %v199_v22 = vpop.f32.mrf.mxu0 }
 0x12c   :  { %v200_v27 = vadd.f32 %v1143_v41, %v199_v22 }
 0x12e   :  { %v249_v32 = vmax.f32 %v200_v27, 0.0  ;;  %v258_v27 = vmax.f32 %v222_v21, 0.0 }
 0x12f   :  { %v360_v24 = vpop.f32.mrf.mxu1 }
 0x130   :  { %v361_v25 = vadd.f32 %v1240_v7, %v360_v24 }
 0x132   :  { %v436_v28 = vmax.f32 %v361_v25, 0.0  ;;  %v224_v25 = vpop.f32.mrf.mxu3 }
 0x133   :  { %v201_v29 = vpop.f32.mrf.mxu0 }
 0x134   :  { %v202_v30 = vadd.f32 %v1143_v41, %v201_v29  ;;  %v466_v31 = vpack.c.bf16 %v436_v28, %v435_v26  ;;  %v257_v26 = vmax.f32 %v220_v20, 0.0 }
 0x136   :  { %v250_v33 = vmax.f32 %v202_v30, 0.0  ;;  %561 = vmatmul.bf16.gmra.mxu2 %v466_v31  ;;  %v275_v30 = vpack.c.bf16 %v258_v27, %v257_v26 }
 0x137   :  { %v363_v34 = vpop.f32.mrf.mxu1 }
 0x138   :  { %v271_v35 = vpack.c.bf16 %v250_v33, %v249_v32  ;;  %v364_v37 = vadd.f32 %v1240_v7, %v363_v34  ;;  %v225_v34 = vadd.f32 %v1143_v41, %v224_v25 }
 0x13a   :  { %402 = vmatmul.bf16.gmra.mxu1 %v271_v35  ;;  %v437_v40 = vmax.f32 %v364_v37, 0.0  ;;  %v226_v31 = vpop.f32.mrf.mxu3 }
 0x13b   :  { %v204_v36 = vpop.f32.mrf.mxu0  ;;  %v227_v35 = vadd.f32 %v1143_v41, %v226_v31 }
 0x13c   :  { %v205_v42 = vadd.f32 %v1143_v41, %v204_v36 }
 0x13e   :  { %v251_v47 = vmax.f32 %v205_v42, 0.0 }
 0x13f   :  { %v365_v38 = vpop.f32.mrf.mxu1 }
 0x140   :  { %v366_v39 = vadd.f32 %v1240_v7, %v365_v38 }
 0x142   :  { %v438_v43 = vmax.f32 %v366_v39, 0.0  ;;  %v259_v39 = vmax.f32 %v225_v34, 0.0 }
 0x143   :  { %v206_v44 = vpop.f32.mrf.mxu0 }
 0x144   :  { %v207_v45 = vadd.f32 %v1143_v41, %v206_v44  ;;  %v467_v46 = vpack.c.bf16 %v438_v43, %v437_v40  ;;  %v260_v40 = vmax.f32 %v227_v35, 0.0 }
 0x146   :  { %v252_v48 = vmax.f32 %v207_v45, 0.0  ;;  %566 = vmatmul.bf16.gmra.mxu2 %v467_v46  ;;  %v276_v44 = vpack.c.bf16 %v260_v40, %v259_v39 }
 0x147   :  { %v368_v49 = vpop.f32.mrf.mxu1 }
 0x148   :  { %v272_v50 = vpack.c.bf16 %v252_v48, %v251_v47  ;;  %v369_v53 = vadd.f32 %v1240_v7, %v368_v49 }
 0x14a   :  { %407 = vmatmul.bf16.gmra.mxu1 %v272_v50  ;;  %v439_v56 = vmax.f32 %v369_v53, 0.0 }
 0x14b   :  { %v209_v51 = vpop.f32.mrf.mxu0 }
 0x14c   :  { %v210_v57 = vadd.f32 %v1143_v41, %v209_v51 }
 0x14e   :  { %v253_v63 = vmax.f32 %v210_v57, 0.0 }
 0x14f   :  { %v370_v54 = vpop.f32.mrf.mxu1 }
 0x150   :  { %v371_v55 = vadd.f32 %v1240_v7, %v370_v54 }
 0x152   :  { %v440_v58 = vmax.f32 %v371_v55, 0.0 }
 0x153   :  { %v211_v59 = vpop.f32.mrf.mxu0 }
 0x154   :  { %v212_v60 = vadd.f32 %v1143_v41, %v211_v59  ;;  %v468_v61 = vpack.c.bf16 %v440_v58, %v439_v56  ;;  %v1277_v59 = vld [vmem:[%s1374_s4 + $0x2] ss:$0 sm:$0xff] }
 0x156   :  { %v254_v0 = vmax.f32 %v212_v60, 0.0  ;;  %571 = vmatmul.bf16.gmra.mxu2 %v468_v61 }
 0x157   :  { %v373_v1 = vpop.f32.mrf.mxu1 }
 0x158   :  { %v273_v2 = vpack.c.bf16 %v254_v0, %v253_v63  ;;  %v374_v3 = vadd.f32 %v1240_v7, %v373_v1 }
 0x15a   :  { %412 = vmatmul.bf16.vlgmr.msrb.gmra.mxu3 %v273_v2  ;;  %v441_v10 = vmax.f32 %v374_v3, 0.0 }
 0x15f   :  { %v375_v4 = vpop.f32.mrf.mxu1 }
 0x160   :  { %v376_v9 = vadd.f32 %v1240_v7, %v375_v4 }
 0x162   :  { %v442_v11 = vmax.f32 %v376_v9, 0.0 }
 0x164   :  { %v469_v14 = vpack.c.bf16 %v442_v11, %v441_v10 }
 0x166   :  { %576 = vmatmul.bf16.gmra.mxu2 %v469_v14 }
 0x167   :  { %v378_v15 = vpop.f32.mrf.mxu1 }
 0x168   :  { %v379_v18 = vadd.f32 %v1240_v7, %v378_v15 }
 0x16a   :  { %417 = vmatmul.bf16.gmra.mxu3 %v274_v16  ;;  %v443_v23 = vmax.f32 %v379_v18, 0.0 }
 0x16f   :  { %v380_v19 = vpop.f32.mrf.mxu1 }
 0x170   :  { %v381_v22 = vadd.f32 %v1240_v7, %v380_v19 }
 0x172   :  { %v444_v24 = vmax.f32 %v381_v22, 0.0 }
 0x174   :  { %v470_v28 = vpack.c.bf16 %v444_v24, %v443_v23 }
 0x176   :  { %581 = vmatmul.bf16.gmra.mxu2 %v470_v28 }
 0x177   :  { %v383_v29 = vpop.f32.mrf.mxu1 }
 0x178   :  { %v384_v32 = vadd.f32 %v1240_v7, %v383_v29 }
 0x17a   :  { %422 = vmatmul.bf16.gmra.mxu3 %v275_v30  ;;  %v445_v37 = vmax.f32 %v384_v32, 0.0 }
 0x17f   :  { %v385_v33 = vpop.f32.mrf.mxu1 }
 0x180   :  { %v386_v36 = vadd.f32 %v1240_v7, %v385_v33 }
 0x182   :  { %v446_v38 = vmax.f32 %v386_v36, 0.0 }
 0x184   :  { %v471_v42 = vpack.c.bf16 %v446_v38, %v445_v37 }
 0x186   :  { %586 = vmatmul.bf16.gmra.mxu2 %v471_v42 }
 0x187   :  { %v388_v43 = vpop.f32.mrf.mxu1 }
 0x188   :  { %v389_v45 = vadd.f32 %v1240_v7, %v388_v43 }
 0x18a   :  { %427 = vmatmul.bf16.gmra.mxu3 %v276_v44  ;;  %v447_v48 = vmax.f32 %v389_v45, 0.0 }
 0x18f   :  { %v390_v46 = vpop.f32.mrf.mxu1 }
 0x190   :  { %v391_v47 = vadd.f32 %v1240_v7, %v390_v46 }
 0x192   :  { %v448_v49 = vmax.f32 %v391_v47, 0.0 }
 0x194   :  { %v472_v50 = vpack.c.bf16 %v448_v49, %v447_v48 }
 0x196   :  { %591 = vmatmul.bf16.gmra.mxu2 %v472_v50 }
 0x197   :  { %v393_v41 = vpop.f32.mrf.mxu1 }
 0x198   :  { %v394_v51 = vadd.f32 %v1240_v7, %v393_v41 }
 0x19a   :  { %v449_v54 = vmax.f32 %v394_v51, 0.0 }
 0x19f   :  { %v395_v52 = vpop.f32.mrf.mxu1 }
 0x1a0   :  { %v396_v53 = vadd.f32 %v1240_v7, %v395_v52 }
 0x1a2   :  { %v450_v55 = vmax.f32 %v396_v53, 0.0 }
 0x1a4   :  { %v473_v56 = vpack.c.bf16 %v450_v55, %v449_v54 }
 0x1a6   :  { %596 = vmatmul.bf16.gmra.mxu2 %v473_v56 }
 0x1a7   :  { %v398_v57 = vpop.f32.mrf.mxu1 }
 0x1a8   :  { %v399_v60 = vadd.f32 %v1240_v7, %v398_v57 }
 0x1a9   :  { %v557_v58 = vpop.f32.mrf.mxu2 }
 0x1aa   :  { %v558_v61 = vadd.f32 %v1277_v59, %v557_v58  ;;  %v451_v1 = vmax.f32 %v399_v60, 0.0 }
 0x1ac   :  { %954 = vtanh.f32 %v558_v61 }
 0x1af   :  { %v400_v62 = vpop.f32.mrf.mxu1 }
 0x1b0   :  { %v401_v63 = vadd.f32 %v1240_v7, %v400_v62 }
 0x1b1   :  { %v559_v0 = vpop.f32.mrf.mxu2 }
 0x1b2   :  { %v452_v2 = vmax.f32 %v401_v63, 0.0  ;;  %v560_v3 = vadd.f32 %v1277_v59, %v559_v0  ;;  %v955_v6 = vpop.eup %954 }
 0x1b4   :  { %956 = vtanh.f32 %v560_v3  ;;  %v474_v4 = vpack.c.bf16 %v452_v2, %v451_v1 }
 0x1b6   :  { %601 = vmatmul.bf16.gmra.mxu2 %v474_v4 }
 0x1b7   :  { %v403_v5 = vpop.f32.mrf.mxu1 }
 0x1b8   :  { %v404_v11 = vadd.f32 %v1240_v7, %v403_v5 }
 0x1b9   :  { %v562_v8 = vpop.f32.mrf.mxu2 }
 0x1ba   :  { %v957_v9 = vpop.eup %956  ;;  %v563_v12 = vadd.f32 %v1277_v59, %v562_v8  ;;  %v453_v16 = vmax.f32 %v404_v11, 0.0 }
 0x1bb   :  { %v841_v10 = vpack.c.bf16 %v957_v9, %v955_v6 }
 0x1bc   :  { %958 = vtanh.f32 %v563_v12 }
 0x1bd   :  { %842 = vst [vmem:[%s1378_s5] sm:$0xff] %v841_v10  }
 0x1bf   :  { %v405_v13 = vpop.f32.mrf.mxu1 }
 0x1c0   :  { %v406_v14 = vadd.f32 %v1240_v7, %v405_v13 }
 0x1c1   :  { %v564_v15 = vpop.f32.mrf.mxu2 }
 0x1c2   :  { %v454_v17 = vmax.f32 %v406_v14, 0.0  ;;  %v565_v18 = vadd.f32 %v1277_v59, %v564_v15  ;;  %v959_v21 = vpop.eup %958 }
 0x1c4   :  { %960 = vtanh.f32 %v565_v18  ;;  %v475_v19 = vpack.c.bf16 %v454_v17, %v453_v16 }
 0x1c6   :  { %606 = vmatmul.bf16.gmra.mxu2 %v475_v19 }
 0x1c7   :  { %v408_v20 = vpop.f32.mrf.mxu1 }
 0x1c8   :  { %v409_v25 = vadd.f32 %v1240_v7, %v408_v20 }
 0x1c9   :  { %v567_v22 = vpop.f32.mrf.mxu2 }
 0x1ca   :  { %v961_v23 = vpop.eup %960  ;;  %v568_v26 = vadd.f32 %v1277_v59, %v567_v22  ;;  %v455_v30 = vmax.f32 %v409_v25, 0.0 }
 0x1cb   :  { %v846_v24 = vpack.c.bf16 %v961_v23, %v959_v21 }
 0x1cc   :  { %962 = vtanh.f32 %v568_v26 }
 0x1cd   :  { %918 = vst [vmem:[%s1378_s5 + $0x8] sm:$0xff] %v846_v24  }
 0x1cf   :  { %v410_v27 = vpop.f32.mrf.mxu1 }
 0x1d0   :  { %v411_v28 = vadd.f32 %v1240_v7, %v410_v27 }
 0x1d1   :  { %v569_v29 = vpop.f32.mrf.mxu2 }
 0x1d2   :  { %v456_v31 = vmax.f32 %v411_v28, 0.0  ;;  %v570_v32 = vadd.f32 %v1277_v59, %v569_v29  ;;  %v963_v34 = vpop.eup %962 }
 0x1d4   :  { %964 = vtanh.f32 %v570_v32  ;;  %v476_v33 = vpack.c.bf16 %v456_v31, %v455_v30 }
 0x1d6   :  { %611 = vmatmul.bf16.gmra.mxu2 %v476_v33 }
 0x1d9   :  { %v572_v35 = vpop.f32.mrf.mxu2 }
 0x1da   :  { %v965_v36 = vpop.eup %964  ;;  %v573_v39 = vadd.f32 %v1277_v59, %v572_v35 }
 0x1db   :  { %v851_v37 = vpack.c.bf16 %v965_v36, %v963_v34 }
 0x1dc   :  { %966 = vtanh.f32 %v573_v39 }
 0x1dd   :  { %919 = vst [vmem:[%s1378_s5 + $0x10] sm:$0xff] %v851_v37   ;;  %v413_v38 = vpop.f32.mrf.mxu3 }
 0x1de   :  { %v414_v43 = vadd.f32 %v1240_v7, %v413_v38 }
 0x1e0   :  { %v457_v46 = vmax.f32 %v414_v43, 0.0 }
 0x1e1   :  { %v574_v40 = vpop.f32.mrf.mxu2 }
 0x1e2   :  { %v575_v42 = vadd.f32 %v1277_v59, %v574_v40  ;;  %v967_v48 = vpop.eup %966 }
 0x1e4   :  { %968 = vtanh.f32 %v575_v42 }
 0x1e5   :  { %v415_v44 = vpop.f32.mrf.mxu3 }
 0x1e6   :  { %v416_v45 = vadd.f32 %v1240_v7, %v415_v44 }
 0x1e8   :  { %v458_v47 = vmax.f32 %v416_v45, 0.0 }
 0x1e9   :  { %v577_v49 = vpop.f32.mrf.mxu2 }
 0x1ea   :  { %v969_v50 = vpop.eup %968  ;;  %v477_v41 = vpack.c.bf16 %v458_v47, %v457_v46  ;;  %v578_v53 = vadd.f32 %v1277_v59, %v577_v49 }
 0x1eb   :  { %v856_v51 = vpack.c.bf16 %v969_v50, %v967_v48 }
 0x1ec   :  { %616 = vmatmul.bf16.vlgmr.msra.gmra.mxu3 %v477_v41  ;;  %970 = vtanh.f32 %v578_v53 }
 0x1ed   :  { %920 = vst [vmem:[%s1378_s5 + $0x18] sm:$0xff] %v856_v51   ;;  %v418_v52 = vpop.f32.mrf.mxu3 }
 0x1ee   :  { %v419_v56 = vadd.f32 %v1240_v7, %v418_v52 }
 0x1f0   :  { %v459_v60 = vmax.f32 %v419_v56, 0.0 }
 0x1f1   :  { %v579_v54 = vpop.f32.mrf.mxu2 }
 0x1f2   :  { %v580_v55 = vadd.f32 %v1277_v59, %v579_v54  ;;  %v971_v62 = vpop.eup %970 }
 0x1f4   :  { %972 = vtanh.f32 %v580_v55 }
 0x1f5   :  { %v420_v57 = vpop.f32.mrf.mxu3 }
 0x1f6   :  { %v421_v58 = vadd.f32 %v1240_v7, %v420_v57 }
 0x1f8   :  { %v460_v61 = vmax.f32 %v421_v58, 0.0 }
 0x1f9   :  { %v582_v63 = vpop.f32.mrf.mxu2 }
 0x1fa   :  { %v973_v0 = vpop.eup %972  ;;  %v478_v1 = vpack.c.bf16 %v460_v61, %v459_v60  ;;  %v583_v4 = vadd.f32 %v1277_v59, %v582_v63 }
 0x1fb   :  { %v861_v2 = vpack.c.bf16 %v973_v0, %v971_v62 }
 0x1fc   :  { %621 = vmatmul.bf16.gmra.mxu3 %v478_v1  ;;  %974 = vtanh.f32 %v583_v4 }
 0x1fd   :  { %921 = vst [vmem:[%s1378_s5 + $0x20] sm:$0xff] %v861_v2   ;;  %v423_v3 = vpop.f32.mrf.mxu3 }
 0x1fe   :  { %v424_v8 = vadd.f32 %v1240_v7, %v423_v3 }
 0x200   :  { %v461_v11 = vmax.f32 %v424_v8, 0.0 }
 0x201   :  { %v584_v5 = vpop.f32.mrf.mxu2 }
 0x202   :  { %v585_v6 = vadd.f32 %v1277_v59, %v584_v5  ;;  %v975_v13 = vpop.eup %974 }
 0x204   :  { %976 = vtanh.f32 %v585_v6 }
 0x205   :  { %v425_v9 = vpop.f32.mrf.mxu3 }
 0x206   :  { %v426_v10 = vadd.f32 %v1240_v7, %v425_v9 }
 0x208   :  { %v462_v12 = vmax.f32 %v426_v10, 0.0 }
 0x209   :  { %v587_v14 = vpop.f32.mrf.mxu2 }
 0x20a   :  { %v977_v15 = vpop.eup %976  ;;  %v479_v16 = vpack.c.bf16 %v462_v12, %v461_v11  ;;  %v588_v19 = vadd.f32 %v1277_v59, %v587_v14 }
 0x20b   :  { %v866_v17 = vpack.c.bf16 %v977_v15, %v975_v13 }
 0x20c   :  { %626 = vmatmul.bf16.gmra.mxu3 %v479_v16  ;;  %978 = vtanh.f32 %v588_v19 }
 0x20d   :  { %922 = vst [vmem:[%s1378_s5 + $0x28] sm:$0xff] %v866_v17   ;;  %v428_v18 = vpop.f32.mrf.mxu3 }
 0x20e   :  { %v429_v22 = vadd.f32 %v1240_v7, %v428_v18 }
 0x210   :  { %v463_v25 = vmax.f32 %v429_v22, 0.0 }
 0x211   :  { %v589_v20 = vpop.f32.mrf.mxu2 }
 0x212   :  { %v590_v21 = vadd.f32 %v1277_v59, %v589_v20  ;;  %v979_v27 = vpop.eup %978 }
 0x214   :  { %980 = vtanh.f32 %v590_v21 }
 0x215   :  { %v430_v23 = vpop.f32.mrf.mxu3 }
 0x216   :  { %v431_v24 = vadd.f32 %v1240_v7, %v430_v23 }
 0x218   :  { %v464_v26 = vmax.f32 %v431_v24, 0.0 }
 0x219   :  { %v592_v28 = vpop.f32.mrf.mxu2 }
 0x21a   :  { %v981_v29 = vpop.eup %980  ;;  %v480_v30 = vpack.c.bf16 %v464_v26, %v463_v25  ;;  %v593_v32 = vadd.f32 %v1277_v59, %v592_v28 }
 0x21b   :  { %v871_v31 = vpack.c.bf16 %v981_v29, %v979_v27 }
 0x21c   :  { %631 = vmatmul.bf16.gmra.mxu3 %v480_v30  ;;  %982 = vtanh.f32 %v593_v32 }
 0x21d   :  { %923 = vst [vmem:[%s1378_s5 + $0x30] sm:$0xff] %v871_v31  }
 0x221   :  { %v594_v33 = vpop.f32.mrf.mxu2 }
 0x222   :  { %v595_v34 = vadd.f32 %v1277_v59, %v594_v33  ;;  %v983_v7 = vpop.eup %982 }
 0x224   :  { %984 = vtanh.f32 %v595_v34 }
 0x229   :  { %v597_v35 = vpop.f32.mrf.mxu2 }
 0x22a   :  { %v985_v36 = vpop.eup %984  ;;  %v598_v38 = vadd.f32 %v1277_v59, %v597_v35 }
 0x22b   :  { %v876_v37 = vpack.c.bf16 %v985_v36, %v983_v7 }
 0x22c   :  { %986 = vtanh.f32 %v598_v38 }
 0x22d   :  { %924 = vst [vmem:[%s1378_s5 + $0x38] sm:$0xff] %v876_v37  }
 0x231   :  { %v599_v39 = vpop.f32.mrf.mxu2 }
 0x232   :  { %v600_v40 = vadd.f32 %v1277_v59, %v599_v39  ;;  %v987_v42 = vpop.eup %986 }
 0x234   :  { %988 = vtanh.f32 %v600_v40 }
 0x239   :  { %v602_v43 = vpop.f32.mrf.mxu2 }
 0x23a   :  { %v989_v44 = vpop.eup %988  ;;  %v603_v46 = vadd.f32 %v1277_v59, %v602_v43 }
 0x23b   :  { %v881_v45 = vpack.c.bf16 %v989_v44, %v987_v42 }
 0x23c   :  { %990 = vtanh.f32 %v603_v46 }
 0x23d   :  { %925 = vst [vmem:[%s1378_s5 + $0x40] sm:$0xff] %v881_v45  }
 0x241   :  { %v604_v47 = vpop.f32.mrf.mxu2 }
 0x242   :  { %v605_v48 = vadd.f32 %v1277_v59, %v604_v47  ;;  %v991_v49 = vpop.eup %990 }
 0x244   :  { %992 = vtanh.f32 %v605_v48 }
 0x249   :  { %v607_v50 = vpop.f32.mrf.mxu2 }
 0x24a   :  { %v993_v41 = vpop.eup %992  ;;  %v608_v52 = vadd.f32 %v1277_v59, %v607_v50 }
 0x24b   :  { %v886_v51 = vpack.c.bf16 %v993_v41, %v991_v49 }
 0x24c   :  { %994 = vtanh.f32 %v608_v52 }
 0x24d   :  { %926 = vst [vmem:[%s1378_s5 + $0x48] sm:$0xff] %v886_v51  }
 0x251   :  { %v609_v53 = vpop.f32.mrf.mxu2 }
 0x252   :  { %v610_v54 = vadd.f32 %v1277_v59, %v609_v53  ;;  %v995_v55 = vpop.eup %994 }
 0x254   :  { %996 = vtanh.f32 %v610_v54 }
 0x259   :  { %v612_v56 = vpop.f32.mrf.mxu2 }
 0x25a   :  { %v997_v57 = vpop.eup %996  ;;  %v613_v60 = vadd.f32 %v1277_v59, %v612_v56 }
 0x25b   :  { %v891_v58 = vpack.c.bf16 %v997_v57, %v995_v55 }
 0x25c   :  { %998 = vtanh.f32 %v613_v60 }
 0x25d   :  { %927 = vst [vmem:[%s1378_s5 + $0x50] sm:$0xff] %v891_v58  }
 0x261   :  { %v614_v61 = vpop.f32.mrf.mxu2 }
 0x262   :  { %v615_v62 = vadd.f32 %v1277_v59, %v614_v61  ;;  %v999_v63 = vpop.eup %998 }
 0x264   :  { %1000 = vtanh.f32 %v615_v62 }
 0x26a   :  { %v1001_v0 = vpop.eup %1000 }
 0x26b   :  { %v896_v1 = vpack.c.bf16 %v1001_v0, %v999_v63 }
 0x26d   :  { %928 = vst [vmem:[%s1378_s5 + $0x58] sm:$0xff] %v896_v1  }
 0x26f   :  { %v617_v2 = vpop.f32.mrf.mxu3 }
 0x270   :  { %v618_v3 = vadd.f32 %v1277_v59, %v617_v2 }
 0x272   :  { %1002 = vtanh.f32 %v618_v3 }
 0x277   :  { %v619_v4 = vpop.f32.mrf.mxu3 }
 0x278   :  { %v620_v5 = vadd.f32 %v1277_v59, %v619_v4  ;;  %v1003_v6 = vpop.eup %1002 }
 0x27a   :  { %1004 = vtanh.f32 %v620_v5 }
 0x27f   :  { %v622_v8 = vpop.f32.mrf.mxu3 }
 0x280   :  { %v1005_v9 = vpop.eup %1004  ;;  %v623_v11 = vadd.f32 %v1277_v59, %v622_v8 }
 0x281   :  { %v901_v10 = vpack.c.bf16 %v1005_v9, %v1003_v6 }
 0x282   :  { %1006 = vtanh.f32 %v623_v11 }
 0x283   :  { %929 = vst [vmem:[%s1378_s5 + $0x60] sm:$0xff] %v901_v10  }
 0x287   :  { %v624_v12 = vpop.f32.mrf.mxu3 }
 0x288   :  { %v625_v13 = vadd.f32 %v1277_v59, %v624_v12  ;;  %v1007_v14 = vpop.eup %1006 }
 0x28a   :  { %1008 = vtanh.f32 %v625_v13 }
 0x28f   :  { %v627_v15 = vpop.f32.mrf.mxu3 }
 0x290   :  { %v1009_v16 = vpop.eup %1008  ;;  %v628_v18 = vadd.f32 %v1277_v59, %v627_v15 }
 0x291   :  { %v906_v17 = vpack.c.bf16 %v1009_v16, %v1007_v14 }
 0x292   :  { %1010 = vtanh.f32 %v628_v18 }
 0x293   :  { %930 = vst [vmem:[%s1378_s5 + $0x68] sm:$0xff] %v906_v17  }
 0x297   :  { %v629_v19 = vpop.f32.mrf.mxu3 }
 0x298   :  { %v630_v20 = vadd.f32 %v1277_v59, %v629_v19  ;;  %v1011_v21 = vpop.eup %1010 }
 0x29a   :  { %1012 = vtanh.f32 %v630_v20 }
 0x29f   :  { %v632_v22 = vpop.f32.mrf.mxu3 }
 0x2a0   :  { %v1013_v23 = vpop.eup %1012  ;;  %v633_v25 = vadd.f32 %v1277_v59, %v632_v22 }
 0x2a1   :  { %v911_v24 = vpack.c.bf16 %v1013_v23, %v1011_v21 }
 0x2a2   :  { %1014 = vtanh.f32 %v633_v25 }
 0x2a3   :  { %931 = vst [vmem:[%s1378_s5 + $0x70] sm:$0xff] %v911_v24  }
 0x2a7   :  { %v634_v26 = vpop.f32.mrf.mxu3 }
 0x2a8   :  { %v635_v27 = vadd.f32 %v1277_v59, %v634_v26  ;;  %v1015_v28 = vpop.eup %1014 }
 0x2aa   :  { %1016 = vtanh.f32 %v635_v27 }
 0x2b0   :  { %v1017_v29 = vpop.eup %1016 }
 0x2b1   :  { %v916_v30 = vpack.c.bf16 %v1017_v29, %v1015_v28 }
 0x2b3   :  { %932 = vst [vmem:[%s1378_s5 + $0x78] sm:$0xff] %v916_v30  }

</bundles_post_ra>
